<compile_context>
chip_gen: v7x
topology: tpu7x:2x2x1
jax: 0.10.0
libtpu: 0.0.40
codegen_flags: <defaults>
</compile_context>

<pallas_src>
import functools

import numpy as np
import jax
import jax.numpy as jnp
from jax.experimental import pallas as pl
from jax.experimental.pallas import tpu as pltpu


# ----------------------------------------------------------------------------
# Packed-parameter layout, shape (H, 128) float32:
#   P[:, 0:2]            = W2[:, 2:4]          (used by the MXU dot)
#   P[k, 8:8+H]          = W1[k, :]    k<F     (VPU FMA rows)
#   P[k, 8+H:10+H]       = Ws[k, :]    k<F
#   P[F, 8:8+H]          = b1
#   P[F, 8+H:10+H]       = bs
#   P[F, 10+H:12+H]      = b2[2:4]
# Built ONCE on the host; lanes 0:8 of rows 0:F are harmless "garbage" for the
# fused FMA (never read back).
# ----------------------------------------------------------------------------
def pack_params(params):
    W1, b1, W2, b2, Ws, bs = (np.asarray(p, np.float32) for p in params)
    F, H = W1.shape
    assert H >= F + 1 and 12 + H <= 128, "packed layout requires F+1 <= H <= 116"
    P = np.zeros((H, 128), np.float32)
    P[:, 0:2] = W2[:, 2:4]
    P[0:F, 8:8 + H] = W1
    P[0:F, 8 + H:10 + H] = Ws
    P[F, 8:8 + H] = b1[0]
    P[F, 8 + H:10 + H] = bs[0]
    P[F, 10 + H:12 + H] = b2[0, 2:4]
    return jnp.asarray(P)


# ----------------------------------------------------------------------------
# Kernel: whole scalar loss in one shot (no grid).
# ----------------------------------------------------------------------------
def _loss_kernel(yp_ref, yt_ref, ydd_ref, td_ref, p_ref, out_ref,
                 *, F, H, L, min_size, c_dd, c_phys, c_peak, dx):
    f32 = jnp.float32
    yp = yp_ref[...]                                   # (B, F)
    B = yp.shape[0]

    # ---- 1) data-driven loss ------------------------------------------------
    ydd = ydd_ref[...]                                 # (B_DD, F)
    dd_total = jnp.sum((yp[:min_size, :] - ydd[:min_size, :]) ** 2) * f32(c_dd)

    # ---- 2) half-cell MLP + surrogate, fused VPU broadcast-FMA --------------
    # acc = yp @ [garbage | W1 | Ws] + [garbage | b1 | bs]  (lanes 0:8 unused)
    acc = p_ref[F:F + 1, :]                            # bias row (1, 128)
    for k in range(F):                                 # static unroll, K = F
        acc = acc + yp[:, k:k + 1] * p_ref[k:k + 1, :]
    h = jnp.tanh(acc[:, 8:8 + H])                      # (B, H)  half-cell hidden
    pred_peaks = acc[:, 8 + H:10 + H]                  # (B, 2)  surrogate output

    # physics loss: only columns 2:4 of the transformed prediction matter.
    w2_24 = p_ref[:, 0:2]                              # (H, 2)
    b2_24 = p_ref[F:F + 1, 10 + H:12 + H]              # (1, 2)
    yp_tr_24 = jnp.dot(h, w2_24, preferred_element_type=f32) + b2_24   # (B, 2)
    phys_sq = (yp_tr_24 - yt_ref[:, 2:4]) ** 2         # (B, 2)

    # ---- 3) peak loss: strict interior local maxima, top-2 by value ---------
    td = td_ref[...]                                   # (B, L)
    ctr = td[:, 1:L - 1]                               # (B, L-2)
    lft = td[:, 0:L - 2]
    rgt = td[:, 2:L]
    is_peak = jnp.logical_and(ctr > lft, ctr > rgt)
    lane = jax.lax.broadcasted_iota(jnp.int32, (B, L - 2), 1)
    NEG = f32(-1e30)

    masked = jnp.where(is_peak, ctr, NEG)
    max1 = jnp.max(masked, axis=1, keepdims=True)
    idx1 = jnp.min(jnp.where(masked == max1, lane, L), axis=1, keepdims=True)
    masked2 = jnp.where(lane == idx1, NEG, masked)
    max2 = jnp.max(masked2, axis=1, keepdims=True)
    idx2 = jnp.min(jnp.where(masked2 == max2, lane, L), axis=1, keepdims=True)
    gate = (max2 > f32(-1e29)).astype(f32)             # (B,1): row has >= 2 peaks

    # local lane j maps to global sample index j+1 of x = linspace(3, 4.2, L)
    pos1 = f32(3.0) + (idx1 + 1).astype(f32) * f32(dx)
    pos2 = f32(3.0) + (idx2 + 1).astype(f32) * f32(dx)
    pos = jnp.concatenate([pos1, pos2], axis=1)        # (B, 2)
    peak_sq = gate * (pos - pred_peaks) ** 2           # (B, 2)

    # ---- total: fuse phys + peak into one tile -> single final reduction ----
    fused = phys_sq * f32(c_phys) + peak_sq * f32(c_peak)
    out_ref[0, 0] = dd_total + jnp.sum(fused)


# ----------------------------------------------------------------------------
# Wrapper.  `packed_params` should be built once via pack_params().
# If this loss is evaluated for many batches per step, fold them into one
# pallas_call with a grid over the batch blocks instead of re-launching.
# ----------------------------------------------------------------------------
def custom_loss_hc(y_pred, y_true, y_true_dd, train_data, packed_params,
                   scaling_factors):
    B, F = y_pred.shape
    assert F >= 4, "physics loss uses columns 2:4"
    H = packed_params.shape[0]
    L = train_data.shape[1]
    min_size = int(min(B, y_true_dd.shape[0]))
    dx = (4.2 - 3.0) / (L - 1)

    # mean -> scaled sums folded into compile-time constants
    c_dd = float(scaling_factors[0]) / (min_size * F)
    c_phys = float(scaling_factors[1]) / (B * 2)
    c_peak = float(scaling_factors[2]) / (2 * B)

    kernel = functools.partial(_loss_kernel, F=F, H=H, L=L, min_size=min_size,
                               c_dd=c_dd, c_phys=c_phys, c_peak=c_peak, dx=dx)

    vmem = pl.BlockSpec(memory_space=pltpu.MemorySpace.VMEM)
    out = pl.pallas_call(
        kernel,
        out_shape=jax.ShapeDtypeStruct((1, 1), jnp.float32),
        in_specs=[vmem, vmem, vmem, vmem, vmem],
        out_specs=pl.BlockSpec(memory_space=pltpu.MemorySpace.SMEM),
    )(y_pred.astype(jnp.float32), y_true.astype(jnp.float32),
      y_true_dd.astype(jnp.float32), train_data.astype(jnp.float32),
      packed_params)
    return out[0, 0]


# ----------------------------------------------------------------------------
# Pure numpy reference (float64, mirrors the PyTorch semantics).
# ----------------------------------------------------------------------------
def reference_loss(y_pred, y_true, y_true_dd, train_data, params, scales):
    W1, b1, W2, b2, Ws, bs = (np.asarray(p, np.float64) for p in params)
    yp = np.asarray(y_pred, np.float64)
    yt = np.asarray(y_true, np.float64)
    ydd = np.asarray(y_true_dd, np.float64)
    td = np.asarray(train_data, np.float64)

    m = min(yp.shape[0], ydd.shape[0])
    dd_loss = np.mean((yp[:m] - ydd[:m]) ** 2)

    h = np.tanh(yp @ W1 + b1)
    yp_tr = h @ W2 + b2
    phys_loss = np.mean((yp_tr[:, 2:4] - yt[:, 2:4]) ** 2)

    pred_peaks = yp @ Ws + bs
    B, L = td.shape
    xs = np.linspace(3.0, 4.2, L)
    sq_sum, n_elems = 0.0, 0
    for i in range(B):
        row = td[i]
        peaks = [j for j in range(1, L - 1)
                 if row[j] > row[j - 1] and row[j] > row[j + 1]]
        peaks = sorted(peaks, key=lambda p: row[p], reverse=True)
        if len(peaks) >= 2:
            pp = np.array([xs[peaks[0]], xs[peaks[1]]])
            sq = (pp - pred_peaks[i]) ** 2
        else:
            sq = np.zeros(2)
        sq_sum += sq.sum()
        n_elems += 2
    peak_loss = sq_sum / n_elems if n_elems else 0.0

    return scales[0] * dd_loss + scales[1] * phys_loss + scales[2] * peak_loss


# ----------------------------------------------------------------------------
if __name__ == "__main__":
    key = jax.random.PRNGKey(0)
    ks = jax.random.split(key, 10)

    B, F, H, L = 8, 4, 32, 100
    B_DD = 6

    y_pred = jax.random.normal(ks[0], (B, F), jnp.float32)
    y_true = jax.random.normal(ks[1], (B, F), jnp.float32)
    y_true_dd = jax.random.normal(ks[2], (B_DD, F), jnp.float32)
    train_data = jax.random.uniform(ks[3], (B, L), jnp.float32)   # synthetic dQdV

    # deterministic synthetic parameters for half-cell MLP and surrogate model
    W1 = 0.3 * jax.random.normal(ks[4], (F, H), jnp.float32)
    b1 = 0.1 * jax.random.normal(ks[5], (1, H), jnp.float32)
    W2 = 0.3 * jax.random.normal(ks[6], (H, F), jnp.float32)
    b2 = 0.1 * jax.random.normal(ks[7], (1, F), jnp.float32)
    Ws = 0.05 * jax.random.normal(ks[8], (F, 2), jnp.float32)
    bs = jnp.array([[3.5, 3.9]], jnp.float32)                     # peak-voltage bias
    params = (W1, b1, W2, b2, Ws, bs)
    scales = (1.0, 0.5, 0.1)

    packed = pack_params(params)                                  # built ONCE
    out = custom_loss_hc(y_pred, y_true, y_true_dd, train_data, packed, scales)
    out = jax.block_until_ready(out)

    ref = reference_loss(y_pred, y_true, y_true_dd, train_data, params, scales)
    assert np.isfinite(float(out))
    assert abs(float(out) - float(ref)) <= 1e-3 + 1e-3 * abs(float(ref)), \
        (float(out), float(ref))
    print("KERNEL_OK")
</pallas_src>

<mosaic_0001>
module attributes {stable_mosaic.version = 11 : i64} {
  func.func @_loss_kernel(%arg0: memref<8x4xf32, #tpu.memory_space<vmem>>, %arg1: memref<8x4xf32, #tpu.memory_space<vmem>>, %arg2: memref<6x4xf32, #tpu.memory_space<vmem>>, %arg3: memref<8x100xf32, #tpu.memory_space<vmem>>, %arg4: memref<32x128xf32, #tpu.memory_space<vmem>>, %arg5: memref<1x1xf32, #tpu.memory_space<smem>>) attributes {dimension_semantics = [], scalar_prefetch = 0 : i64, scratch_operands = 0 : i64, tpu.core_type = #tpu.core_type<tc>} {
    %c0 = arith.constant 0 : index
    %c0_0 = arith.constant 0 : index
    %0 = vector.load %arg0[%c0, %c0_0] : memref<8x4xf32, #tpu.memory_space<vmem>>, vector<8x4xf32>
    %c0_1 = arith.constant 0 : index
    %c0_2 = arith.constant 0 : index
    %1 = vector.load %arg2[%c0_1, %c0_2] : memref<6x4xf32, #tpu.memory_space<vmem>>, vector<6x4xf32>
    %2 = vector.extract_strided_slice %0 {offsets = [0, 0], sizes = [6, 4], strides = [1, 1]} : vector<8x4xf32> to vector<6x4xf32>
    %3 = arith.subf %2, %1 : vector<6x4xf32>
    %4 = arith.mulf %3, %3 : vector<6x4xf32>
    %5 = vector.shape_cast %4 : vector<6x4xf32> to vector<1x6x4xf32>
    %cst = arith.constant dense<0.000000e+00> : vector<1xf32>
    %6 = vector.multi_reduction <add>, %5, %cst [1, 2] : vector<1x6x4xf32> to vector<1xf32>
    %7 = vector.shape_cast %6 : vector<1xf32> to vector<1x1x1xf32>
    %8 = vector.extract %7[0, 0, 0] : f32 from vector<1x1x1xf32>
    %cst_3 = arith.constant 0.0416666679 : f32
    %9 = arith.mulf %8, %cst_3 : f32
    %c4 = arith.constant 4 : index
    %c0_4 = arith.constant 0 : index
    %10 = vector.load %arg4[%c4, %c0_4] : memref<32x128xf32, #tpu.memory_space<vmem>>, vector<1x128xf32>
    %11 = vector.extract_strided_slice %0 {offsets = [0, 0], sizes = [8, 1], strides = [1, 1]} : vector<8x4xf32> to vector<8x1xf32>
    %c0_5 = arith.constant 0 : index
    %c0_6 = arith.constant 0 : index
    %12 = vector.load %arg4[%c0_5, %c0_6] : memref<32x128xf32, #tpu.memory_space<vmem>>, vector<1x128xf32>
    %13 = vector.broadcast %11 : vector<8x1xf32> to vector<8x128xf32>
    %14 = vector.broadcast %12 : vector<1x128xf32> to vector<8x128xf32>
    %15 = arith.mulf %13, %14 : vector<8x128xf32>
    %16 = vector.broadcast %10 : vector<1x128xf32> to vector<8x128xf32>
    %17 = arith.addf %16, %15 : vector<8x128xf32>
    %18 = vector.extract_strided_slice %0 {offsets = [0, 1], sizes = [8, 1], strides = [1, 1]} : vector<8x4xf32> to vector<8x1xf32>
    %c1 = arith.constant 1 : index
    %c0_7 = arith.constant 0 : index
    %19 = vector.load %arg4[%c1, %c0_7] : memref<32x128xf32, #tpu.memory_space<vmem>>, vector<1x128xf32>
    %20 = vector.broadcast %18 : vector<8x1xf32> to vector<8x128xf32>
    %21 = vector.broadcast %19 : vector<1x128xf32> to vector<8x128xf32>
    %22 = arith.mulf %20, %21 : vector<8x128xf32>
    %23 = arith.addf %17, %22 : vector<8x128xf32>
    %24 = vector.extract_strided_slice %0 {offsets = [0, 2], sizes = [8, 1], strides = [1, 1]} : vector<8x4xf32> to vector<8x1xf32>
    %c2 = arith.constant 2 : index
    %c0_8 = arith.constant 0 : index
    %25 = vector.load %arg4[%c2, %c0_8] : memref<32x128xf32, #tpu.memory_space<vmem>>, vector<1x128xf32>
    %26 = vector.broadcast %24 : vector<8x1xf32> to vector<8x128xf32>
    %27 = vector.broadcast %25 : vector<1x128xf32> to vector<8x128xf32>
    %28 = arith.mulf %26, %27 : vector<8x128xf32>
    %29 = arith.addf %23, %28 : vector<8x128xf32>
    %30 = vector.extract_strided_slice %0 {offsets = [0, 3], sizes = [8, 1], strides = [1, 1]} : vector<8x4xf32> to vector<8x1xf32>
    %c3 = arith.constant 3 : index
    %c0_9 = arith.constant 0 : index
    %31 = vector.load %arg4[%c3, %c0_9] : memref<32x128xf32, #tpu.memory_space<vmem>>, vector<1x128xf32>
    %32 = vector.broadcast %30 : vector<8x1xf32> to vector<8x128xf32>
    %33 = vector.broadcast %31 : vector<1x128xf32> to vector<8x128xf32>
    %34 = arith.mulf %32, %33 : vector<8x128xf32>
    %35 = arith.addf %29, %34 : vector<8x128xf32>
    %36 = vector.extract_strided_slice %35 {offsets = [0, 8], sizes = [8, 32], strides = [1, 1]} : vector<8x128xf32> to vector<8x32xf32>
    %37 = math.tanh %36 : vector<8x32xf32>
    %38 = vector.extract_strided_slice %35 {offsets = [0, 40], sizes = [8, 2], strides = [1, 1]} : vector<8x128xf32> to vector<8x2xf32>
    %c0_10 = arith.constant 0 : index
    %c0_11 = arith.constant 0 : index
    %39 = vector.load %arg4[%c0_10, %c0_11] : memref<32x128xf32, #tpu.memory_space<vmem>>, vector<32x2xf32>
    %c4_12 = arith.constant 4 : index
    %c42 = arith.constant 42 : index
    %40 = vector.load %arg4[%c4_12, %c42] : memref<32x128xf32, #tpu.memory_space<vmem>>, vector<1x2xf32>
    %cst_13 = arith.constant dense<0.000000e+00> : vector<8x2xf32>
    %41 = tpu.matmul %37, %39, %cst_13 {dimension_numbers = #tpu.dot_dimension_numbers<[1], [0], [0], [1], [0, 0, 1, 1], [], []>} : vector<8x32xf32>, vector<32x2xf32>, vector<8x2xf32> -> vector<8x2xf32>
    %42 = vector.broadcast %40 : vector<1x2xf32> to vector<8x2xf32>
    %43 = arith.addf %41, %42 : vector<8x2xf32>
    %c0_14 = arith.constant 0 : index
    %c2_15 = arith.constant 2 : index
    %44 = vector.load %arg1[%c0_14, %c2_15] : memref<8x4xf32, #tpu.memory_space<vmem>>, vector<8x2xf32>
    %45 = arith.subf %43, %44 : vector<8x2xf32>
    %46 = arith.mulf %45, %45 : vector<8x2xf32>
    %c0_16 = arith.constant 0 : index
    %c0_17 = arith.constant 0 : index
    %47 = vector.load %arg3[%c0_16, %c0_17] : memref<8x100xf32, #tpu.memory_space<vmem>>, vector<8x100xf32>
    %48 = vector.extract_strided_slice %47 {offsets = [0, 1], sizes = [8, 98], strides = [1, 1]} : vector<8x100xf32> to vector<8x98xf32>
    %49 = vector.extract_strided_slice %47 {offsets = [0, 0], sizes = [8, 98], strides = [1, 1]} : vector<8x100xf32> to vector<8x98xf32>
    %50 = vector.extract_strided_slice %47 {offsets = [0, 2], sizes = [8, 98], strides = [1, 1]} : vector<8x100xf32> to vector<8x98xf32>
    %51 = arith.cmpf ogt, %48, %49 : vector<8x98xf32>
    %52 = arith.cmpf ogt, %48, %50 : vector<8x98xf32>
    %53 = arith.andi %51, %52 : vector<8x98xi1>
    %54 = tpu.iota {dimensions = array<i32: 1>} : vector<8x98xi32>
    %cst_18 = arith.constant -1.000000e+30 : f32
    %55 = vector.broadcast %cst_18 : f32 to vector<8x98xf32>
    %56 = arith.select %53, %48, %55 : vector<8x98xi1>, vector<8x98xf32>
    %cst_19 = arith.constant dense<0xFF800000> : vector<8xf32>
    %57 = vector.multi_reduction <maximumf>, %56, %cst_19 [1] : vector<8x98xf32> to vector<8xf32>
    %58 = vector.shape_cast %57 : vector<8xf32> to vector<8x1xf32>
    %59 = vector.broadcast %58 : vector<8x1xf32> to vector<8x98xf32>
    %60 = arith.cmpf oeq, %56, %59 : vector<8x98xf32>
    %c100_i32 = arith.constant 100 : i32
    %61 = vector.broadcast %c100_i32 : i32 to vector<8x98xi32>
    %62 = arith.select %60, %54, %61 : vector<8x98xi1>, vector<8x98xi32>
    %cst_20 = arith.constant dense<2147483647> : vector<8xi32>
    %63 = vector.multi_reduction <minsi>, %62, %cst_20 [1] : vector<8x98xi32> to vector<8xi32>
    %64 = vector.shape_cast %63 : vector<8xi32> to vector<8x1xi32>
    %65 = vector.broadcast %64 : vector<8x1xi32> to vector<8x98xi32>
    %66 = arith.cmpi eq, %54, %65 : vector<8x98xi32>
    %cst_21 = arith.constant -1.000000e+30 : f32
    %67 = vector.broadcast %cst_21 : f32 to vector<8x98xf32>
    %68 = arith.select %66, %67, %56 : vector<8x98xi1>, vector<8x98xf32>
    %cst_22 = arith.constant dense<0xFF800000> : vector<8xf32>
    %69 = vector.multi_reduction <maximumf>, %68, %cst_22 [1] : vector<8x98xf32> to vector<8xf32>
    %70 = vector.shape_cast %69 : vector<8xf32> to vector<8x1xf32>
    %71 = vector.broadcast %70 : vector<8x1xf32> to vector<8x98xf32>
    %72 = arith.cmpf oeq, %68, %71 : vector<8x98xf32>
    %c100_i32_23 = arith.constant 100 : i32
    %73 = vector.broadcast %c100_i32_23 : i32 to vector<8x98xi32>
    %74 = arith.select %72, %54, %73 : vector<8x98xi1>, vector<8x98xi32>
    %cst_24 = arith.constant dense<2147483647> : vector<8xi32>
    %75 = vector.multi_reduction <minsi>, %74, %cst_24 [1] : vector<8x98xi32> to vector<8xi32>
    %76 = vector.shape_cast %75 : vector<8xi32> to vector<8x1xi32>
    %cst_25 = arith.constant -1.000000e+29 : f32
    %77 = vector.broadcast %cst_25 : f32 to vector<8x1xf32>
    %78 = arith.cmpf ogt, %70, %77 : vector<8x1xf32>
    %79 = arith.extui %78 : vector<8x1xi1> to vector<8x1xi32>
    %80 = arith.sitofp %79 : vector<8x1xi32> to vector<8x1xf32>
    %c1_i32 = arith.constant 1 : i32
    %81 = vector.broadcast %c1_i32 : i32 to vector<8x1xi32>
    %82 = arith.addi %64, %81 : vector<8x1xi32>
    %83 = arith.sitofp %82 : vector<8x1xi32> to vector<8x1xf32>
    %cst_26 = arith.constant 0.0121212117 : f32
    %84 = vector.broadcast %cst_26 : f32 to vector<8x1xf32>
    %85 = arith.mulf %83, %84 : vector<8x1xf32>
    %cst_27 = arith.constant 3.000000e+00 : f32
    %86 = vector.broadcast %cst_27 : f32 to vector<8x1xf32>
    %87 = arith.addf %86, %85 : vector<8x1xf32>
    %c1_i32_28 = arith.constant 1 : i32
    %88 = vector.broadcast %c1_i32_28 : i32 to vector<8x1xi32>
    %89 = arith.addi %76, %88 : vector<8x1xi32>
    %90 = arith.sitofp %89 : vector<8x1xi32> to vector<8x1xf32>
    %cst_29 = arith.constant 0.0121212117 : f32
    %91 = vector.broadcast %cst_29 : f32 to vector<8x1xf32>
    %92 = arith.mulf %90, %91 : vector<8x1xf32>
    %cst_30 = arith.constant 3.000000e+00 : f32
    %93 = vector.broadcast %cst_30 : f32 to vector<8x1xf32>
    %94 = arith.addf %93, %92 : vector<8x1xf32>
    %95 = tpu.concatenate %87, %94 in 1 : vector<8x1xf32>, vector<8x1xf32> -> vector<8x2xf32>
    %96 = arith.subf %95, %38 : vector<8x2xf32>
    %97 = arith.mulf %96, %96 : vector<8x2xf32>
    %98 = vector.broadcast %80 : vector<8x1xf32> to vector<8x2xf32>
    %99 = arith.mulf %98, %97 : vector<8x2xf32>
    %cst_31 = arith.constant 3.125000e-02 : f32
    %100 = vector.broadcast %cst_31 : f32 to vector<8x2xf32>
    %101 = arith.mulf %46, %100 : vector<8x2xf32>
    %cst_32 = arith.constant 6.250000e-03 : f32
    %102 = vector.broadcast %cst_32 : f32 to vector<8x2xf32>
    %103 = arith.mulf %99, %102 : vector<8x2xf32>
    %104 = arith.addf %101, %103 : vector<8x2xf32>
    %105 = vector.shape_cast %104 : vector<8x2xf32> to vector<1x8x2xf32>
    %cst_33 = arith.constant dense<0.000000e+00> : vector<1xf32>
    %106 = vector.multi_reduction <add>, %105, %cst_33 [1, 2] : vector<1x8x2xf32> to vector<1xf32>
    %107 = vector.shape_cast %106 : vector<1xf32> to vector<1x1x1xf32>
    %108 = vector.extract %107[0, 0, 0] : f32 from vector<1x1x1xf32>
    %109 = arith.addf %9, %108 : f32
    %c0_34 = arith.constant 0 : index
    %c0_35 = arith.constant 0 : index
    %110 = memref.load %arg5[%c0_34, %c0_35] : memref<1x1xf32, #tpu.memory_space<smem>>
    memref.store %109, %arg5[%c0_34, %c0_35] : memref<1x1xf32, #tpu.memory_space<smem>>
    return
  }
}

</mosaic_0001>

<bundles_post_ra>
// kernel: tpu_custom_call.1
= control target key start
LH: loop header
LB: loop body
LE: loop exit
PB: predicated region body
PF: predicated region fallthrough
CT: control target
= control target key end

     0   :  { %s476_s0 = inlined_call_operand.vmem [shape: f32[8,4], index: 0, kind: input, shape index: {}]   ;;  %s477_s1 = inlined_call_operand.vmem [shape: f32[8,4], index: 1, kind: input, shape index: {}]   ;;  %s478_s2 = inlined_call_operand.vmem [shape: f32[6,4], index: 2, kind: input, shape index: {}]   ;;  %s479_s3 = inlined_call_operand.vmem [shape: f32[8,100], index: 3, kind: input, shape index: {}]   ;;  %s480_s4 = inlined_call_operand.vmem [shape: f32[32,128], index: 4, kind: input, shape index: {}]   ;;  %s481_s5 = inlined_call_operand.hbm [shape: f32[1,1], index: 5, kind: output, shape index: {}]  }
   0x1   :  { %v179_v0 = vld [vmem:[%s479_s3] sm:$0xff] }
   0x2   :  { %10 = vsyncpa [#allocation3], 0  ;;  %s359_s20 = smov 1   ;;  %s360_s21 = smov 127   ;;  %vm193_vm2 = vcmask 809992   ;;  %v190_v5 = vlaneseq  ;;  %v414_v7 = vld [vmem:[%s476_s0] sm:$0xff] }
   0x3   :  { %181 = vrot.lane.b32.xlu0 %v179_v0, %s359_s20  ;;  %v361_v8 = vmov 0   ;;  %v362_v9 = vmov 3   ;;  %v363_v10 = vmov 1   ;;  %v364_v11 = vmov 2   ;;  %v293_v18 = vld [vmem:[%s480_s4] ss:$0 sm:$0xff] }
   0x4   :  { %v408_v6 = vand.u32 127, %v190_v5  ;;  %340 = vset.pattern.permute.xlu1 %v361_v8  ;;  %344 = vset.pattern.permute.xlu0 %v362_v9  ;;  %v428_v21 = vld [vmem:[%s480_s4 + $0x4] ss:$0 sm:$0xff]  ;;  %v295_v22 = vld [vmem:[%s480_s4 + $0x1] ss:$0 sm:$0xff]  ;;  %s365_s7 = smov 120  }
   0x5   :  { %v296_v26 = vld [vmem:[%s480_s4 + $0x2] ss:$0 sm:$0xff]  ;;  %v297_v30 = vld [vmem:[%s480_s4 + $0x3] ss:$0 sm:$0xff]  ;;  %v89_v41 = vld [vmem:[%s480_s4 + $0x8] sm:$0xff]  ;;  %v366_v43 = vmov 0.0|0.0  }
   0x6   :  { %v88_v40 = vld [vmem:[%s480_s4] sm:$0xff]  ;;  %v90_v42 = vld [vmem:[%s480_s4 + $0x10] sm:$0xff]  ;;  %316 = vmatprep.subr.bf16.mxu0 %v366_v43  ;;  %v91_v45 = vld [vmem:[%s480_s4 + $0x18] sm:$0xff]  ;;  %vm367_vm6 = vmmov 0   ;;  %v368_v46 = vmov 0.0   ;;  %vm99_vm7 = vcmask 261120  }
   0x7   :  { %185 = vrot.lane.b32.xlu0 %v179_v0, %s360_s21  ;;  %v317_v44 = vpack.c.bf16 %v89_v41, %v88_v40  ;;  %313 = vmatprep.mubr.msk.f32.mxu0 %vm367_vm6, %v368_v46  ;;  %v320_v48 = vpack.c.bf16 %v91_v45, %v90_v42  ;;  %vm222_vm8 = vcmask 801792   ;;  %s369_s4 = smov 88   ;;  %s370_s16 = smov 86   ;;  %v22_v5 = vld [vmem:[%s478_s2] sm:$0x3f]  ;;  %vm25_vm12 = vcmask 29696  }
   0x8   :  { %s371_s19 = smov 126   ;;  %vm254_vm13 = vcmask 7168   ;;  %vm266_vm15 = vcmask 15360   ;;  %s347_s24 = scalar_lea.hbm %s481_s5, 16 }
   0x9   :  { %318 = vmatpush3.bf16.msra.mxu0 %v317_v44  ;;  %p348_p0 = scmp.ne.s32.totalorder %s481_s5, %s347_s24  ;;  %p351_p1 = scmp.lt.u32.totalorder %s347_s24, %s481_s5 }
   0xa   :  { %319 = vmatprep.subr.bf16.mxu0 %v366_v43 }
   0xb   :  { %p353_p2 = pnand %p351_p1, %p348_p0 }
   0xd   :  { %321 = vmatpush3.bf16.msra.mxu0 %v320_v48 }
  0x75   :  { %v182_v1 = vpop.permute.xlu0 %181 }
  0x76   :  { %vm184_vm0 = vcmp.gt.f32.partialorder %v179_v0, %v182_v1 }
  0x79   :  { %v186_v2 = vpop.permute.xlu0 %185 }
  0x7a   :  { %vm188_vm1 = vcmp.gt.f32.partialorder %v179_v0, %v186_v2 }
  0x7b   :  { %vm189_vm3 = vmand %vm184_vm0, %vm188_vm1 }
  0x7c   :  { %v192_v3 = vsel %vm189_vm3, %v179_v0, -1e+30 }
  0x7d   :  { %v194_v4 = vsel %vm193_vm2, %v192_v3, -inf }
  0x7e   :  { %195 = vmax.xlane.f32.xlu1 %v194_v4  ;;  %v172_v4 = vld [vmem:[%s477_s1] sm:$0xff] }
  0x8f   :  { %198 = vrot.lane.b32.xlu1 %v408_v6, %s359_s20 }
  0x93   :  { %41 = vperm.xlu1 %340, %v414_v7  }
  0x97   :  { %341 = vset.pattern.permute.xlu1 %v363_v10 }
  0x98   :  { %56 = vperm.xlu1 %341, %v414_v7  }
  0x9c   :  { %342 = vset.pattern.permute.xlu1 %v364_v11 }
  0x9d   :  { %67 = vperm.xlu1 %342, %v414_v7  }
  0xa1   :  { %343 = vset.pattern.permute.xlu1 %v362_v9 }
  0xa2   :  { %78 = vperm.xlu1 %343, %v414_v7  }
 0x10b   :  { %v196_v12 = vpop.xlane.xlu1 %195 }
 0x10c   :  { %vm197_vm4 = vcmp.eq.f32.partialorder %v192_v3, %v196_v12 }
 0x10f   :  { %v199_v13 = vpop.permute.xlu1 %198 }
 0x110   :  { %v200_v14 = vsel %vm197_vm4, %v199_v13, 100 }
 0x111   :  { %v201_v15 = vsel %vm193_vm2, %v200_v14, 2147483647 }
 0x112   :  { %v203_v16 = vshra.s32 %v201_v15, 16  ;;  %v202_v36 = vand.u32 65535, %v201_v15 }
 0x113   :  { %v42_v19 = vpop.permute.xlu1 %41 }
 0x114   :  { %v205_v17 = vcvt.s32.f32 %v203_v16  ;;  %v48_v20 = vmul.f32 %v293_v18, %v42_v19  ;;  %v204_v38 = vcvt.s32.f32 %v202_v36 }
 0x116   :  { %206 = vmin.xlane.f32.xlu0 %v205_v17  ;;  %v53_v24 = vadd.f32 %v428_v21, %v48_v20 }
 0x117   :  { %v57_v23 = vpop.permute.xlu1 %56 }
 0x118   :  { %v63_v25 = vmul.f32 %v295_v22, %v57_v23 }
 0x11a   :  { %v64_v27 = vadd.f32 %v63_v25, %v53_v24 }
 0x11c   :  { %v68_v28 = vpop.permute.xlu1 %67 }
 0x11d   :  { %v74_v29 = vmul.f32 %v296_v26, %v68_v28 }
 0x11f   :  { %v75_v31 = vadd.f32 %v74_v29, %v64_v27 }
 0x121   :  { %v79_v32 = vpop.permute.xlu1 %78 }
 0x122   :  { %v85_v33 = vmul.f32 %v297_v30, %v79_v32 }
 0x124   :  { %v86_v34 = vadd.f32 %v85_v33, %v75_v31 }
 0x126   :  { %345 = vtanh.f32 %v86_v34 }
 0x12c   :  { %218 = vrot.lane.b32.xlu0 %v192_v3, %s360_s21 }
 0x130   :  { %v346_v35 = vpop.eup %345 }
 0x131   :  { %93 = vrot.lane.b32.xlu0 %v346_v35, %s365_s7 }
 0x1a3   :  { %v207_v37 = vpop.xlane.xlu0 %206 }
 0x1a4   :  { %vm208_vm5 = vcmp.eq.f32.partialorder %v205_v17, %v207_v37  ;;  %v213_v50 = vcvt.f32.s32 %v207_v37 }
 0x1a5   :  { %v209_v39 = vsel %vm208_vm5, %v204_v38, inf }
 0x1a6   :  { %210 = vmin.xlane.f32.xlu1 %v209_v39  ;;  %v214_v52 = vshll.u32 %v213_v50, 16 }
 0x1a7   :  { %v219_v47 = vpop.permute.xlu0 %218 }
 0x1ab   :  { %v94_v49 = vpop.permute.xlu0 %93 }
 0x1ac   :  { %314 = vmatmul.mubr.msk.f32.vlgmr.msra.gmra.mrb[0].mxu0 %vm99_vm7, %v94_v49 }
 0x233   :  { %v211_v51 = vpop.xlane.xlu1 %210 }
 0x234   :  { %v212_v53 = vcvt.f32.s32 %v211_v51 }
 0x236   :  { %v215_v54 = vadd.s32 %v214_v52, %v212_v53 }
 0x238   :  { %vm216_vm9 = vcmp.eq.s32.totalorder %v408_v6, %v215_v54  ;;  %v246_v12 = vadd.s32 1, %v215_v54 }
 0x239   :  { %v221_v55 = vsel %vm216_vm9, -1e+30, %v219_v47 }
 0x23a   :  { %v223_v56 = vsel %vm222_vm8, %v221_v55, -inf  ;;  %v247_v16 = vcvt.s32.f32 %v246_v12 }
 0x23b   :  { %224 = vmax.xlane.f32.xlu0 %v223_v56 }
 0x23c   :  { %v248_v19 = vmul.f32 0.012121212, %v247_v16 }
 0x251   :  { %257 = vrot.lane.b32.xlu0 %v86_v34, %s369_s4 }
 0x27f   :  { %v168_v57 = vpop.f32.mrb[0].mxu0 }
 0x280   :  { %v315_v58 = vpop.f32.mrb[1].mxu0 }
 0x2c8   :  { %v225_v59 = vpop.xlane.xlu0 %224 }
 0x2c9   :  { %vm226_vm10 = vcmp.eq.f32.partialorder %v221_v55, %v225_v59  ;;  %vm243_vm14 = vcmp.gt.f32.partialorder %v225_v59, -1e+29 }
 0x2ca   :  { %v227_v60 = vsel %vm226_vm10, %v408_v6, 100  ;;  %v23_v6 = vsub.f32 %v414_v7, %v22_v5  ;;  %v249_v7 = vadd.f32 3.0, %v248_v19  ;;  %v299_v31 = vsel %vm243_vm14, 1.0, %v368_v46 }
 0x2cb   :  { %v228_v61 = vsel %vm222_vm8, %v227_v60, 2147483647 }
 0x2cc   :  { %v230_v62 = vshra.s32 %v228_v61, 16  ;;  %v229_v0 = vand.u32 65535, %v228_v61  ;;  %v24_v8 = vmul.f32 %v23_v6, %v23_v6  ;;  %v258_v26 = vpop.permute.xlu0 %257 }
 0x2ce   :  { %v232_v63 = vcvt.s32.f32 %v230_v62  ;;  %v231_v2 = vcvt.s32.f32 %v229_v0  ;;  %v26_v9 = vsel %vm25_vm12, %v24_v8, 0.0 }
 0x2d0   :  { %233 = vmin.xlane.f32.xlu1 %v232_v63 }
 0x2e1   :  { %96 = vrot.lane.b32.xlu1 %v428_v21, %s370_s16 }
 0x35d   :  { %v234_v1 = vpop.xlane.xlu1 %233 }
 0x35e   :  { %vm235_vm11 = vcmp.eq.f32.partialorder %v232_v63, %v234_v1  ;;  %v240_v11 = vcvt.f32.s32 %v234_v1 }
 0x35f   :  { %v236_v3 = vsel %vm235_vm11, %v231_v2, inf }
 0x360   :  { %237 = vmin.xlane.f32.xlu1 %v236_v3  ;;  %v241_v14 = vshll.u32 %v240_v11, 16 }
 0x361   :  { %v97_v10 = vpop.permute.xlu1 %96 }
 0x362   :  { %v169_v23 = vadd.f32 %v168_v57, %v97_v10 }
 0x371   :  { %174 = vrot.lane.b32.xlu1 %v172_v4, %s371_s19 }
 0x395   :  { %27 = vadd.xlane.f32.xlu1 %v26_v9 }
 0x3ed   :  { %v238_v13 = vpop.xlane.xlu1 %237 }
 0x3ee   :  { %v239_v15 = vcvt.f32.s32 %v238_v13 }
 0x3f0   :  { %v242_v17 = vadd.s32 %v241_v14, %v239_v15 }
 0x3f1   :  { %v175_v22 = vpop.permute.xlu1 %174 }
 0x3f2   :  { %v250_v18 = vadd.s32 1, %v242_v17  ;;  %v177_v25 = vsub.f32 %v169_v23, %v175_v22 }
 0x3f4   :  { %v251_v20 = vcvt.s32.f32 %v250_v18  ;;  %v178_v29 = vmul.f32 %v177_v25, %v177_v25 }
 0x3f6   :  { %v252_v21 = vmul.f32 0.012121212, %v251_v20  ;;  %v263_v33 = vmul.f32 0.03125, %v178_v29 }
 0x3f8   :  { %v253_v24 = vadd.f32 3.0, %v252_v21 }
 0x3fa   :  { %v255_v27 = vsel %vm254_vm13, %v249_v7, %v253_v24 }
 0x3fb   :  { %v260_v28 = vsub.f32 %v255_v27, %v258_v26 }
 0x3fd   :  { %v261_v30 = vmul.f32 %v260_v28, %v260_v28 }
 0x3ff   :  { %v262_v32 = vmul.f32 %v299_v31, %v261_v30 }
 0x401   :  { %v264_v34 = vmul.f32 0.00625, %v262_v32 }
 0x403   :  { %v265_v35 = vadd.f32 %v264_v34, %v263_v33 }
 0x405   :  { %v267_v36 = vsel %vm266_vm15, %v265_v35, 0.0 }
 0x406   :  { %268 = vadd.xlane.f32.xlu0 %v267_v36 }
 0x422   :  { %v28_v37 = vpop.xlane.xlu1 %27 }
 0x423   :  { %v29_v38 = vrot.slane %v28_v37, 4 }
 0x425   :  { %v30_v39 = vadd.f32 %v29_v38, %v28_v37 }
 0x427   :  { %v31_v40 = vrot.slane %v30_v39, 2 }
 0x429   :  { %v32_v41 = vadd.f32 %v31_v40, %v30_v39 }
 0x42b   :  { %v33_v42 = vrot.slane %v32_v41, 1 }
 0x42d   :  { %v34_v43 = vadd.f32 %v33_v42, %v32_v41 }
 0x42f   :  { %322 = vpush %v34_v43 }
 0x460   :  { %s323_s1 = spop %322 }
 0x461   :  { %s36_s2 = smul.f32 0.041666668, %s323_s1 }
 0x493   :  { %v269_v44 = vpop.xlane.xlu0 %268 }
 0x494   :  { %v270_v45 = vrot.slane %v269_v44, 4 }
 0x496   :  { %v271_v47 = vadd.f32 %v270_v45, %v269_v44 }
 0x498   :  { %v272_v48 = vrot.slane %v271_v47, 2 }
 0x49a   :  { %v273_v46 = vadd.f32 %v272_v48, %v271_v47 }
 0x49c   :  { %v274_v49 = vrot.slane %v273_v46, 1 }
 0x49e   :  { %v275_v50 = vadd.f32 %v274_v49, %v273_v46 }
 0x4a0   :  { %324 = vpush %v275_v50 }
 0x4d1   :  { %s325_s3 = spop %324 }
 0x4d2   :  { %s277_s22 = sadd.f32 %s325_s3, %s36_s2 }
 0x4d4   :  { %279 = sst [smem:[#allocation2]] %s277_s22 }
 0x4d5   :  { %356 = shalt.err (!%p353_p2)
}
 0x4d6   :  { %s372_s29 = smov [#allocation2]  }
 0x4d7   :  { %287 = dma.smem_to_hbm %s372_s29, 16, %s481_s5, [#allocation3]  }
 0x4d8   :  { %357 = dma.done.wait [#allocation3], 16  }
 0x4d9   :  { %358 = vsyncadd [#allocation3], 4294967280 }
 0x4da   :  { %291 = sfence }
 0x4db   :  { %292 = vsyncpa [#allocation3], 1 }

</bundles_post_ra>
